<compile_context>
chip_gen: v7x
topology: tpu7x:2x2x1
jax: 0.10.0
libtpu: 0.0.40
codegen_flags: <defaults>
</compile_context>

<pallas_src>
import jax
import jax.numpy as jnp
from jax import lax
from jax.experimental import pallas as pl
from jax.experimental.pallas import tpu as pltpu


def _round_up(x, m):
    return ((x + m - 1) // m) * m


def _cdiv(a, b):
    return -(-a // b)


def _default_vmem_limit():
    """Per-chip scoped-VMEM limit with headroom (v7x: ~48 MiB, v5e/v6e: ~96 MiB)."""
    try:
        info = pltpu.get_tpu_info()
        cap = getattr(info, "vmem_capacity_bytes", None)
        if cap:
            return int(min(cap * 3 // 4, 100 * 1024 * 1024))
    except Exception:
        pass
    return 32 * 1024 * 1024  # conservative fallback, safe on every chip


def _pick_tiling(B, F_in, F_out, x_bytes, w_bytes, vmem_limit_bytes, max_tile_b):
    """Pick (tile_b, steps) against the real (lane-padded) VMEM footprint."""
    f_in_lanes = _round_up(F_in, 128)
    f_out_lanes = _round_up(F_out, 128)
    # Resident operands (single-buffered): W (+ tiny bias, padded to (8,128) tiles).
    resident = _round_up(F_in, 16) * f_out_lanes * w_bytes + 8 * f_out_lanes * 4
    # Streamed, double-buffered per-row bytes: x tile + f32 out tile, plus one
    # extra f32 row of headroom for the in-kernel f32 intermediates / scratch.
    per_row = (2 * f_in_lanes * x_bytes
               + 2 * f_out_lanes * 4
               + f_in_lanes * 4 + f_out_lanes * 4)
    budget = int(0.7 * vmem_limit_bytes) - resident
    tile_cap = max(8, (budget // per_row) // 8 * 8) if budget > 0 else 8
    tile_cap = int(min(tile_cap, max_tile_b))

    B8 = _round_up(B, 8)
    # >=2 grid steps for non-trivial batches so dimension_semantics=("parallel",)
    # can shard the grid across both TensorCores on v7x.
    min_steps = 2 if B8 >= 16 else 1
    steps = max(min_steps, _cdiv(B8, tile_cap))
    tile_b = _round_up(_cdiv(B8, steps), 8)   # pads at most a handful of rows
    return tile_b, steps


def style_encoder_kernel(x_ref, w_ref, b_ref, o_ref):
    # --- encoder_net: linear layer (MXU, f32 accumulation) ---
    y = jnp.dot(x_ref[...], w_ref[...],
                preferred_element_type=jnp.float32)          # [TILE_B, F_out]
    y = y + b_ref[...].astype(jnp.float32)                   # bias broadcast (f32)

    # --- F.normalize(y, p=2, dim=1) ---
    # PyTorch: y / clamp_min(||y||_2, 1e-12) == y * rsqrt(max(sum(y^2), 1e-24))
    sq_sum = jnp.sum(y * y, axis=-1, keepdims=True)          # [TILE_B, 1]
    inv = lax.rsqrt(jnp.maximum(sq_sum, 1e-24))              # EUP rsqrt
    o_ref[...] = (y * inv).astype(o_ref.dtype)


def style_encoder(x, w, b, *, compute_dtype=jnp.bfloat16, max_tile_b=2048,
                  vmem_limit_bytes=None):
    """x: [B, F_in], w: [F_in, F_out] (nn.Linear weight pre-transposed), b: [F_out].

    Returns f32 [B, F_out] row-normalized embeddings.
    """
    B, F_in = x.shape
    F_out = w.shape[1]
    if vmem_limit_bytes is None:
        vmem_limit_bytes = _default_vmem_limit()

    # bf16 for the streamed x and the resident W (MXU inputs); f32 bias/epilogue.
    x_c = x.astype(compute_dtype)
    w_c = w.astype(compute_dtype)
    b2 = b.reshape(1, F_out).astype(jnp.float32)
    x_bytes = jnp.dtype(compute_dtype).itemsize

    tile_b, steps = _pick_tiling(B, F_in, F_out, x_bytes, x_bytes,
                                 vmem_limit_bytes, max_tile_b)
    B_p = tile_b * steps
    if B_p != B:
        x_c = jnp.pad(x_c, ((0, B_p - B), (0, 0)))   # <8 pad rows per grid step

    cost = pl.CostEstimate(
        flops=2 * B_p * F_in * F_out,
        transcendentals=B_p,
        bytes_accessed=(x_bytes * (B_p * F_in + F_in * F_out)
                        + 4 * F_out + 4 * B_p * F_out),
    )

    def _run(single_buffer_resident):
        if single_buffer_resident:
            # Constant index_map -> never re-fetched; one buffer is enough.
            w_spec = pl.BlockSpec((F_in, F_out), lambda i: (0, 0),
                                  pipeline_mode=pl.Buffered(1))
            b_spec = pl.BlockSpec((1, F_out), lambda i: (0, 0),
                                  pipeline_mode=pl.Buffered(1))
        else:
            w_spec = pl.BlockSpec((F_in, F_out), lambda i: (0, 0))
            b_spec = pl.BlockSpec((1, F_out), lambda i: (0, 0))

        return pl.pallas_call(
            style_encoder_kernel,
            out_shape=jax.ShapeDtypeStruct((B_p, F_out), jnp.float32),
            grid_spec=pltpu.PrefetchScalarGridSpec(
                num_scalar_prefetch=0,
                grid=(steps,),
                in_specs=[
                    pl.BlockSpec((tile_b, F_in), lambda i: (i, 0)),  # x: streamed
                    w_spec,                                          # W: resident
                    b_spec,                                          # b: resident
                ],
                # F_out kept unpadded: block last dim == full array dim is legal,
                # and it halves the output HBM writeback vs. zero-padding to 128.
                out_specs=pl.BlockSpec((tile_b, F_out), lambda i: (i, 0)),
            ),
            compiler_params=pltpu.CompilerParams(
                dimension_semantics=("parallel",),   # rows independent -> both TCs
                vmem_limit_bytes=int(vmem_limit_bytes),
            ),
            cost_estimate=cost,
        )(x_c, w_c, b2)

    try:
        out = jax.block_until_ready(_run(True))
    except Exception:
        # Fallback if this JAX build rejects Buffered(1) on resident operands.
        out = jax.block_until_ready(_run(False))

    # Only a (<8-row) batch slice remains; skipped entirely when B needed no pad.
    return out if B_p == B else out[:B]


if __name__ == "__main__":
    key = jax.random.PRNGKey(0)
    k_x, k_w, k_b = jax.random.split(key, 3)

    B, F_in, F_out = 8, 32, 64          # small synthetic shapes

    x = jax.random.normal(k_x, (B, F_in), dtype=jnp.float32)
    # PyTorch nn.Linear(F_in, F_out): weight [F_out, F_in], bias [F_out];
    # stored pre-transposed as [F_in, F_out].
    w = jax.random.normal(k_w, (F_in, F_out), dtype=jnp.float32) * 0.05
    b = jax.random.normal(k_b, (F_out,), dtype=jnp.float32) * 0.01

    out = style_encoder(x, w, b)
    out = jax.block_until_ready(out)
    assert out.shape == (B, F_out), f"bad shape {out.shape}"

    # Reference 1: same bf16 MXU numerics in plain JAX (tight tolerance).
    y_bf = jnp.dot(x.astype(jnp.bfloat16), w.astype(jnp.bfloat16),
                   preferred_element_type=jnp.float32) + b[None, :]
    ref_bf = y_bf / jnp.maximum(
        jnp.sqrt(jnp.sum(y_bf * y_bf, axis=1, keepdims=True)), 1e-12)
    assert jnp.allclose(out, ref_bf, atol=2e-3, rtol=2e-3), "mismatch vs bf16 reference"

    # Reference 2: full-f32 PyTorch-equivalent reference (bf16-appropriate tolerance).
    y32 = x @ w + b[None, :]
    ref32 = y32 / jnp.maximum(
        jnp.sqrt(jnp.sum(y32 * y32, axis=1, keepdims=True)), 1e-12)
    assert jnp.allclose(out, ref32, atol=3e-2, rtol=3e-2), "mismatch vs f32 reference"

    # Rows must be unit-norm (normalization runs in f32 regardless of MXU dtype).
    assert jnp.allclose(jnp.linalg.norm(out, axis=1), 1.0, atol=1e-4)

    print("KERNEL_OK")
</pallas_src>

<mosaic_0001>
module attributes {stable_mosaic.version = 11 : i64} {
  func.func @style_encoder_kernel(%arg0: i32, %arg1: memref<8x32xbf16, #tpu.memory_space<vmem>>, %arg2: memref<32x64xbf16, #tpu.memory_space<vmem>>, %arg3: memref<1x64xf32, #tpu.memory_space<vmem>>, %arg4: memref<8x64xf32, #tpu.memory_space<vmem>>) attributes {dimension_semantics = [#tpu.dimension_semantics<parallel>], iteration_bounds = array<i64: 1>, scalar_prefetch = 0 : i64, scratch_operands = 0 : i64, tpu.core_type = #tpu.core_type<tc>, window_params = [{transform_indices = @transform_0, window_bounds = array<i64: 8, 32>}, {pipeline_mode = #tpu.pipeline_mode<synchronous>, transform_indices = @transform_1, window_bounds = array<i64: 32, 64>}, {pipeline_mode = #tpu.pipeline_mode<synchronous>, transform_indices = @transform_2, window_bounds = array<i64: 1, 64>}, {transform_indices = @transform_3, window_bounds = array<i64: 8, 64>}]} {
    %c0 = arith.constant 0 : index
    %c0_0 = arith.constant 0 : index
    %0 = vector.load %arg1[%c0, %c0_0] : memref<8x32xbf16, #tpu.memory_space<vmem>>, vector<8x32xbf16>
    %c0_1 = arith.constant 0 : index
    %c0_2 = arith.constant 0 : index
    %1 = vector.load %arg2[%c0_1, %c0_2] : memref<32x64xbf16, #tpu.memory_space<vmem>>, vector<32x64xbf16>
    %cst = arith.constant dense<0.000000e+00> : vector<8x64xf32>
    %2 = tpu.matmul %0, %1, %cst {dimension_numbers = #tpu.dot_dimension_numbers<[1], [0], [0], [1], [0, 0, 1, 1], [], []>} : vector<8x32xbf16>, vector<32x64xbf16>, vector<8x64xf32> -> vector<8x64xf32>
    %c0_3 = arith.constant 0 : index
    %c0_4 = arith.constant 0 : index
    %3 = vector.load %arg3[%c0_3, %c0_4] : memref<1x64xf32, #tpu.memory_space<vmem>>, vector<1x64xf32>
    %4 = vector.broadcast %3 : vector<1x64xf32> to vector<8x64xf32>
    %5 = arith.addf %2, %4 : vector<8x64xf32>
    %6 = arith.mulf %5, %5 : vector<8x64xf32>
    %cst_5 = arith.constant dense<0.000000e+00> : vector<8xf32>
    %7 = vector.multi_reduction <add>, %6, %cst_5 [1] : vector<8x64xf32> to vector<8xf32>
    %8 = vector.shape_cast %7 : vector<8xf32> to vector<8x1xf32>
    %cst_6 = arith.constant 1.000000e-24 : f32
    %9 = vector.broadcast %cst_6 : f32 to vector<8x1xf32>
    %10 = arith.maximumf %8, %9 : vector<8x1xf32>
    %11 = math.rsqrt %10 : vector<8x1xf32>
    %12 = vector.broadcast %11 : vector<8x1xf32> to vector<8x64xf32>
    %13 = arith.mulf %5, %12 : vector<8x64xf32>
    %c0_7 = arith.constant 0 : index
    %c0_8 = arith.constant 0 : index
    %14 = vector.load %arg4[%c0_7, %c0_8] : memref<8x64xf32, #tpu.memory_space<vmem>>, vector<8x64xf32>
    tpu.vector_store %arg4[%c0_7, %c0_8], %13 {strides = array<i32>} : memref<8x64xf32, #tpu.memory_space<vmem>>, vector<8x64xf32>,
    return
  }
  func.func @transform_0(%arg0: i32) -> (i32, i32) {
    %c0_i32 = arith.constant 0 : i32
    %c0_i32_0 = arith.constant 0 : i32
    return %arg0, %c0_i32 : i32, i32
  }
  func.func @transform_1(%arg0: i32) -> (i32, i32) {
    %c0_i32 = arith.constant 0 : i32
    %c0_i32_0 = arith.constant 0 : i32
    %c0_i32_1 = arith.constant 0 : i32
    return %c0_i32, %c0_i32_0 : i32, i32
  }
  func.func @transform_2(%arg0: i32) -> (i32, i32) {
    %c0_i32 = arith.constant 0 : i32
    %c0_i32_0 = arith.constant 0 : i32
    %c0_i32_1 = arith.constant 0 : i32
    return %c0_i32, %c0_i32_0 : i32, i32
  }
  func.func @transform_3(%arg0: i32) -> (i32, i32) {
    %c0_i32 = arith.constant 0 : i32
    %c0_i32_0 = arith.constant 0 : i32
    return %arg0, %c0_i32 : i32, i32
  }
}

module attributes {stable_mosaic.version = 11 : i64} {
  func.func @style_encoder_kernel(%arg0: i32, %arg1: memref<8x32xbf16, #tpu.memory_space<vmem>>, %arg2: memref<32x64xbf16, #tpu.memory_space<vmem>>, %arg3: memref<1x64xf32, #tpu.memory_space<vmem>>, %arg4: memref<8x64xf32, #tpu.memory_space<vmem>>) attributes {dimension_semantics = [#tpu.dimension_semantics<parallel>], iteration_bounds = array<i64: 1>, scalar_prefetch = 0 : i64, scratch_operands = 0 : i64, tpu.core_type = #tpu.core_type<tc>, window_params = [{transform_indices = @transform_0, window_bounds = array<i64: 8, 32>}, {pipeline_mode = #tpu.pipeline_mode<synchronous>, transform_indices = @transform_1, window_bounds = array<i64: 32, 64>}, {pipeline_mode = #tpu.pipeline_mode<synchronous>, transform_indices = @transform_2, window_bounds = array<i64: 1, 64>}, {transform_indices = @transform_3, window_bounds = array<i64: 8, 64>}]} {
    %c0 = arith.constant 0 : index
    %c0_0 = arith.constant 0 : index
    %0 = vector.load %arg1[%c0, %c0_0] : memref<8x32xbf16, #tpu.memory_space<vmem>>, vector<8x32xbf16>
    %c0_1 = arith.constant 0 : index
    %c0_2 = arith.constant 0 : index
    %1 = vector.load %arg2[%c0_1, %c0_2] : memref<32x64xbf16, #tpu.memory_space<vmem>>, vector<32x64xbf16>
    %cst = arith.constant dense<0.000000e+00> : vector<8x64xf32>
    %2 = tpu.matmul %0, %1, %cst {dimension_numbers = #tpu.dot_dimension_numbers<[1], [0], [0], [1], [0, 0, 1, 1], [], []>} : vector<8x32xbf16>, vector<32x64xbf16>, vector<8x64xf32> -> vector<8x64xf32>
    %c0_3 = arith.constant 0 : index
    %c0_4 = arith.constant 0 : index
    %3 = vector.load %arg3[%c0_3, %c0_4] : memref<1x64xf32, #tpu.memory_space<vmem>>, vector<1x64xf32>
    %4 = vector.broadcast %3 : vector<1x64xf32> to vector<8x64xf32>
    %5 = arith.addf %2, %4 : vector<8x64xf32>
    %6 = arith.mulf %5, %5 : vector<8x64xf32>
    %cst_5 = arith.constant dense<0.000000e+00> : vector<8xf32>
    %7 = vector.multi_reduction <add>, %6, %cst_5 [1] : vector<8x64xf32> to vector<8xf32>
    %8 = vector.shape_cast %7 : vector<8xf32> to vector<8x1xf32>
    %cst_6 = arith.constant 1.000000e-24 : f32
    %9 = vector.broadcast %cst_6 : f32 to vector<8x1xf32>
    %10 = arith.maximumf %8, %9 : vector<8x1xf32>
    %11 = math.rsqrt %10 : vector<8x1xf32>
    %12 = vector.broadcast %11 : vector<8x1xf32> to vector<8x64xf32>
    %13 = arith.mulf %5, %12 : vector<8x64xf32>
    %c0_7 = arith.constant 0 : index
    %c0_8 = arith.constant 0 : index
    %14 = vector.load %arg4[%c0_7, %c0_8] : memref<8x64xf32, #tpu.memory_space<vmem>>, vector<8x64xf32>
    tpu.vector_store %arg4[%c0_7, %c0_8], %13 {strides = array<i32>} : memref<8x64xf32, #tpu.memory_space<vmem>>, vector<8x64xf32>,
    return
  }
  func.func @transform_0(%arg0: i32) -> (i32, i32) {
    %c0_i32 = arith.constant 0 : i32
    %c0_i32_0 = arith.constant 0 : i32
    return %arg0, %c0_i32 : i32, i32
  }
  func.func @transform_1(%arg0: i32) -> (i32, i32) {
    %c0_i32 = arith.constant 0 : i32
    %c0_i32_0 = arith.constant 0 : i32
    %c0_i32_1 = arith.constant 0 : i32
    return %c0_i32, %c0_i32_0 : i32, i32
  }
  func.func @transform_2(%arg0: i32) -> (i32, i32) {
    %c0_i32 = arith.constant 0 : i32
    %c0_i32_0 = arith.constant 0 : i32
    %c0_i32_1 = arith.constant 0 : i32
    return %c0_i32, %c0_i32_0 : i32, i32
  }
  func.func @transform_3(%arg0: i32) -> (i32, i32) {
    %c0_i32 = arith.constant 0 : i32
    %c0_i32_0 = arith.constant 0 : i32
    return %arg0, %c0_i32 : i32, i32
  }
}

</mosaic_0001>

<bundles_post_ra>
// kernel: tpu_custom_call.1
= control target key start
LH: loop header
LB: loop body
LE: loop exit
PB: predicated region body
PF: predicated region fallthrough
CT: control target
= control target key end

     0   :  { %8 = vsyncpa [#allocation3], 0  ;;  %s306_s0 = inlined_call_operand.hbm [shape: bf16[8,32], index: 0, kind: input, shape index: {}]   ;;  %s307_s1 = inlined_call_operand.hbm [shape: bf16[32,64], index: 1, kind: input, shape index: {}]   ;;  %s308_s2 = inlined_call_operand.vmem [shape: f32[1,64], index: 2, kind: input, shape index: {}]   ;;  %s309_s3 = inlined_call_operand.hbm [shape: f32[8,64], index: 3, kind: output, shape index: {}]  }
   0x1   :  { %9 = vsyncpa [#allocation6], 0 }
   0x2   :  { %10 = vsyncpa [#allocation4], 0  ;;  %s233_s12 = smov [#allocation2]   ;;  %s234_s14 = smov [#allocation5]  }
   0x3   :  { %s17_s13 = sshll.u32 %s233_s12, 4  ;;  %s26_s15 = sshll.u32 %s234_s14, 4  ;;  %s18_s13 = int_to_ptr.vmem [resolvable:$true] %s17_s13  ;;  %s260_s15 = int_to_ptr.vmem [resolvable:$true] %s26_s15 }
   0x4   :  { %s161_s18 = scalar_lea.hbm %s306_s0, 64 }
   0x5   :  { %p162_p0 = scmp.ne.s32.totalorder %s306_s0, %s161_s18  ;;  %p165_p1 = scmp.lt.u32.totalorder %s161_s18, %s306_s0 }
   0x7   :  { %p167_p2 = pnand %p165_p1, %p162_p0 }
   0x9   :  { %170 = shalt.err (!%p167_p2)
}
   0xa   :  { %s171_s23 = scalar_lea.vmem %s18_s13, 64  ;;  %p176_p4 = scmp.lt.s32.totalorder %s18_s13, %s18_s13 }
   0xb   :  { %p172_p3 = scmp.ne.s32.totalorder %s18_s13, %s171_s23  ;;  %p177_p5 = scmp.lt.s32.totalorder %s171_s23, %s171_s23 }
   0xd   :  { %p178_p6 = por %p177_p5, %p176_p4 }
   0xf   :  { %p179_p7 = pnand %p178_p6, %p172_p3 }
  0x11   :  { %182 = shalt.err (!%p179_p7)
}
  0x12   :  { %20 = dma.hbm_to_vmem [thread:$0]  %s306_s0, 64, %s18_s13, [#allocation3]  }
  0x13   :  { %s183_s28 = scalar_lea.hbm %s307_s1, 256 }
  0x14   :  { %p184_p8 = scmp.ne.s32.totalorder %s307_s1, %s183_s28  ;;  %p187_p9 = scmp.lt.u32.totalorder %s183_s28, %s307_s1 }
  0x16   :  { %p189_p10 = pnand %p187_p9, %p184_p8 }
  0x18   :  { %192 = shalt.err (!%p189_p10)
}
  0x19   :  { %s193_s6 = scalar_lea.vmem %s260_s15, 256  ;;  %p198_p12 = scmp.lt.s32.totalorder %s260_s15, %s260_s15 }
  0x1a   :  { %p194_p11 = scmp.ne.s32.totalorder %s260_s15, %s193_s6  ;;  %p199_p13 = scmp.lt.s32.totalorder %s193_s6, %s193_s6 }
  0x1c   :  { %p200_p0 = por %p199_p13, %p198_p12 }
  0x1e   :  { %p201_p1 = pnand %p200_p0, %p194_p11 }
  0x20   :  { %204 = shalt.err (!%p201_p1)
}
  0x21   :  { %s235_s0 = smov 64   ;;  %s236_s7 = smov 4  }
  0x22   :  { %32 = dma.hbm_to_vmem [thread:$0]  %s307_s1, 256, %s260_s15, [#allocation6], %s235_s0, %s235_s0, %s236_s7  }
  0x23   :  { %227 = dma.done.wait [#allocation3], 64  }
  0x24   :  { %228 = vsyncadd [#allocation3], 4294967232 }
  0x25   :  { %229 = dma.done.wait [#allocation6], 256  }
  0x26   :  { %230 = vsyncadd [#allocation6], 4294967040  ;;  %v237_v0 = vmov 0.0   ;;  %vm238_vm0 = vmmov 0   ;;  %v157_v1 = vld [vmem:[#allocation5] sm:$0xff]   ;;  %v158_v2 = vld [vmem:[#allocation5 + $0x8] sm:$0xff]  }
  0x27   :  { %142 = vmatprep.subr.bf16.mxu0 %v237_v0  ;;  %146 = vmatprep.mubr.msk.bf16.mxu0 %vm238_vm0, %v237_v0  ;;  %v42_v3 = vld [vmem:[#allocation2] sm:$0xf]  ;;  %vm66_vm1 = vcmask 261120   ;;  %vm111_vm2 = vcmask 523264   ;;  %s239_s1 = smov [#allocation7]  }
  0x28   :  { %143 = vmatpush3.bf16.msra.mxu0 %v157_v1  ;;  %v135_v4 = vld [vmem:[%s308_s2] ss:$0 sm:$0xff]  ;;  %s125_s12 = sshll.u32 %s239_s1, 4  ;;  %s126_s12 = int_to_ptr.vmem [resolvable:$true] %s125_s12 }
  0x29   :  { %144 = vmatprep.subr.bf16.mxu0 %v237_v0  ;;  %s205_s13 = scalar_lea.vmem %s126_s12, 128  ;;  %p210_p3 = scmp.lt.s32.totalorder %s126_s12, %s126_s12 }
  0x2a   :  { %p206_p2 = scmp.ne.s32.totalorder %s126_s12, %s205_s13  ;;  %p211_p4 = scmp.lt.s32.totalorder %s205_s13, %s205_s13 }
  0x2c   :  { %145 = vmatpush3.bf16.msra.mxu0 %v158_v2  ;;  %p212_p5 = por %p211_p4, %p210_p3 }
  0x2e   :  { %p213_p6 = pnand %p212_p5, %p206_p2 }
  0x2f   :  { %147 = vmatmul.mubr.msk.bf16.vlgmr.msra.gmra.mrb[0].mxu0 %vm66_vm1, %v42_v3 }
 0x102   :  { %v104_v5 = vpop.f32.mrb[0].mxu0 }
 0x103   :  { %v105_v6 = vadd.f32 %v135_v4, %v104_v5  ;;  %v148_v7 = vpop.f32.mrb[1].mxu0 }
 0x104   :  { %v107_v8 = vpop.f32.mrb[2].mxu0 }
 0x105   :  { %v149_v9 = vpop.f32.mrb[3].mxu0  ;;  %v110_v10 = vmul.f32 %v105_v6, %v105_v6 }
 0x107   :  { %v112_v11 = vsel %vm111_vm2, %v110_v10, 0.0 }
 0x108   :  { %113 = vadd.xlane.f32.xlu0 %v112_v11 }
 0x195   :  { %v114_v12 = vpop.xlane.xlu0 %113 }
 0x196   :  { %v115_v13 = vmax.f32 %v114_v12, 1e-24 }
 0x198   :  { %159 = vrsqrt.f32 %v115_v13 }
 0x1a2   :  { %v160_v14 = vpop.eup %159 }
 0x1a3   :  { %v117_v15 = vmul.f32 %v160_v14, %v105_v6 }
 0x1a5   :  { %118 = vst.msk [vmem:[#allocation7] sm:$0xff] %vm111_vm2, %v117_v15 }
 0x1a6   :  { %216 = shalt.err (!%p213_p6)
}
 0x1a7   :  { %s217_s15 = scalar_lea.hbm %s309_s3, 128 }
 0x1a8   :  { %p218_p7 = scmp.ne.s32.totalorder %s309_s3, %s217_s15  ;;  %p221_p8 = scmp.lt.u32.totalorder %s217_s15, %s309_s3 }
 0x1aa   :  { %p223_p9 = pnand %p221_p8, %p218_p7 }
 0x1ac   :  { %226 = shalt.err (!%p223_p9)
}
 0x1ad   :  { %128 = dma.vmem_to_hbm [thread:$0]  %s126_s12, 128, %s309_s3, [#allocation4]  }
 0x1ae   :  { %231 = dma.done.wait [#allocation4], 128  }
 0x1af   :  { %232 = vsyncadd [#allocation4], 4294967168 }
 0x1b0   :  { %132 = vsyncpa [#allocation3], 1 }
 0x1b1   :  { %133 = vsyncpa [#allocation6], 1 }
 0x1b2   :  { %134 = vsyncpa [#allocation4], 1 }

// kernel: tpu_custom_call.1
= control target key start
LH: loop header
LB: loop body
LE: loop exit
PB: predicated region body
PF: predicated region fallthrough
CT: control target
= control target key end

     0   :  { %8 = vsyncpa [#allocation3], 0  ;;  %s306_s0 = inlined_call_operand.hbm [shape: bf16[8,32], index: 0, kind: input, shape index: {}]   ;;  %s307_s1 = inlined_call_operand.hbm [shape: bf16[32,64], index: 1, kind: input, shape index: {}]   ;;  %s308_s2 = inlined_call_operand.vmem [shape: f32[1,64], index: 2, kind: input, shape index: {}]   ;;  %s309_s3 = inlined_call_operand.hbm [shape: f32[8,64], index: 3, kind: output, shape index: {}]  }
   0x1   :  { %9 = vsyncpa [#allocation6], 0 }
   0x2   :  { %10 = vsyncpa [#allocation4], 0  ;;  %s233_s12 = smov [#allocation2]   ;;  %s234_s14 = smov [#allocation5]  }
   0x3   :  { %s17_s13 = sshll.u32 %s233_s12, 4  ;;  %s26_s15 = sshll.u32 %s234_s14, 4  ;;  %s18_s13 = int_to_ptr.vmem [resolvable:$true] %s17_s13  ;;  %s260_s15 = int_to_ptr.vmem [resolvable:$true] %s26_s15 }
   0x4   :  { %s161_s18 = scalar_lea.hbm %s306_s0, 64 }
   0x5   :  { %p162_p0 = scmp.ne.s32.totalorder %s306_s0, %s161_s18  ;;  %p165_p1 = scmp.lt.u32.totalorder %s161_s18, %s306_s0 }
   0x7   :  { %p167_p2 = pnand %p165_p1, %p162_p0 }
   0x9   :  { %170 = shalt.err (!%p167_p2)
}
   0xa   :  { %s171_s23 = scalar_lea.vmem %s18_s13, 64  ;;  %p176_p4 = scmp.lt.s32.totalorder %s18_s13, %s18_s13 }
   0xb   :  { %p172_p3 = scmp.ne.s32.totalorder %s18_s13, %s171_s23  ;;  %p177_p5 = scmp.lt.s32.totalorder %s171_s23, %s171_s23 }
   0xd   :  { %p178_p6 = por %p177_p5, %p176_p4 }
   0xf   :  { %p179_p7 = pnand %p178_p6, %p172_p3 }
  0x11   :  { %182 = shalt.err (!%p179_p7)
}
  0x12   :  { %20 = dma.hbm_to_vmem [thread:$0]  %s306_s0, 64, %s18_s13, [#allocation3]  }
  0x13   :  { %s183_s28 = scalar_lea.hbm %s307_s1, 256 }
  0x14   :  { %p184_p8 = scmp.ne.s32.totalorder %s307_s1, %s183_s28  ;;  %p187_p9 = scmp.lt.u32.totalorder %s183_s28, %s307_s1 }
  0x16   :  { %p189_p10 = pnand %p187_p9, %p184_p8 }
  0x18   :  { %192 = shalt.err (!%p189_p10)
}
  0x19   :  { %s193_s6 = scalar_lea.vmem %s260_s15, 256  ;;  %p198_p12 = scmp.lt.s32.totalorder %s260_s15, %s260_s15 }
  0x1a   :  { %p194_p11 = scmp.ne.s32.totalorder %s260_s15, %s193_s6  ;;  %p199_p13 = scmp.lt.s32.totalorder %s193_s6, %s193_s6 }
  0x1c   :  { %p200_p0 = por %p199_p13, %p198_p12 }
  0x1e   :  { %p201_p1 = pnand %p200_p0, %p194_p11 }
  0x20   :  { %204 = shalt.err (!%p201_p1)
}
  0x21   :  { %s235_s0 = smov 64   ;;  %s236_s7 = smov 4  }
  0x22   :  { %32 = dma.hbm_to_vmem [thread:$0]  %s307_s1, 256, %s260_s15, [#allocation6], %s235_s0, %s235_s0, %s236_s7  }
  0x23   :  { %227 = dma.done.wait [#allocation3], 64  }
  0x24   :  { %228 = vsyncadd [#allocation3], 4294967232 }
  0x25   :  { %229 = dma.done.wait [#allocation6], 256  }
  0x26   :  { %230 = vsyncadd [#allocation6], 4294967040  ;;  %v237_v0 = vmov 0.0   ;;  %vm238_vm0 = vmmov 0   ;;  %v157_v1 = vld [vmem:[#allocation5] sm:$0xff]   ;;  %v158_v2 = vld [vmem:[#allocation5 + $0x8] sm:$0xff]  }
  0x27   :  { %142 = vmatprep.subr.bf16.mxu0 %v237_v0  ;;  %146 = vmatprep.mubr.msk.bf16.mxu0 %vm238_vm0, %v237_v0  ;;  %v42_v3 = vld [vmem:[#allocation2] sm:$0xf]  ;;  %vm66_vm1 = vcmask 261120   ;;  %vm111_vm2 = vcmask 523264   ;;  %s239_s1 = smov [#allocation7]  }
  0x28   :  { %143 = vmatpush3.bf16.msra.mxu0 %v157_v1  ;;  %v135_v4 = vld [vmem:[%s308_s2] ss:$0 sm:$0xff]  ;;  %s125_s12 = sshll.u32 %s239_s1, 4  ;;  %s126_s12 = int_to_ptr.vmem [resolvable:$true] %s125_s12 }
  0x29   :  { %144 = vmatprep.subr.bf16.mxu0 %v237_v0  ;;  %s205_s13 = scalar_lea.vmem %s126_s12, 128  ;;  %p210_p3 = scmp.lt.s32.totalorder %s126_s12, %s126_s12 }
  0x2a   :  { %p206_p2 = scmp.ne.s32.totalorder %s126_s12, %s205_s13  ;;  %p211_p4 = scmp.lt.s32.totalorder %s205_s13, %s205_s13 }
  0x2c   :  { %145 = vmatpush3.bf16.msra.mxu0 %v158_v2  ;;  %p212_p5 = por %p211_p4, %p210_p3 }
  0x2e   :  { %p213_p6 = pnand %p212_p5, %p206_p2 }
  0x2f   :  { %147 = vmatmul.mubr.msk.bf16.vlgmr.msra.gmra.mrb[0].mxu0 %vm66_vm1, %v42_v3 }
 0x102   :  { %v104_v5 = vpop.f32.mrb[0].mxu0 }
 0x103   :  { %v105_v6 = vadd.f32 %v135_v4, %v104_v5  ;;  %v148_v7 = vpop.f32.mrb[1].mxu0 }
 0x104   :  { %v107_v8 = vpop.f32.mrb[2].mxu0 }
 0x105   :  { %v149_v9 = vpop.f32.mrb[3].mxu0  ;;  %v110_v10 = vmul.f32 %v105_v6, %v105_v6 }
 0x107   :  { %v112_v11 = vsel %vm111_vm2, %v110_v10, 0.0 }
 0x108   :  { %113 = vadd.xlane.f32.xlu0 %v112_v11 }
 0x195   :  { %v114_v12 = vpop.xlane.xlu0 %113 }
 0x196   :  { %v115_v13 = vmax.f32 %v114_v12, 1e-24 }
 0x198   :  { %159 = vrsqrt.f32 %v115_v13 }
 0x1a2   :  { %v160_v14 = vpop.eup %159 }
 0x1a3   :  { %v117_v15 = vmul.f32 %v160_v14, %v105_v6 }
 0x1a5   :  { %118 = vst.msk [vmem:[#allocation7] sm:$0xff] %vm111_vm2, %v117_v15 }
 0x1a6   :  { %216 = shalt.err (!%p213_p6)
}
 0x1a7   :  { %s217_s15 = scalar_lea.hbm %s309_s3, 128 }
 0x1a8   :  { %p218_p7 = scmp.ne.s32.totalorder %s309_s3, %s217_s15  ;;  %p221_p8 = scmp.lt.u32.totalorder %s217_s15, %s309_s3 }
 0x1aa   :  { %p223_p9 = pnand %p221_p8, %p218_p7 }
 0x1ac   :  { %226 = shalt.err (!%p223_p9)
}
 0x1ad   :  { %128 = dma.vmem_to_hbm [thread:$0]  %s126_s12, 128, %s309_s3, [#allocation4]  }
 0x1ae   :  { %231 = dma.done.wait [#allocation4], 128  }
 0x1af   :  { %232 = vsyncadd [#allocation4], 4294967168 }
 0x1b0   :  { %132 = vsyncpa [#allocation3], 1 }
 0x1b1   :  { %133 = vsyncpa [#allocation6], 1 }
 0x1b2   :  { %134 = vsyncpa [#allocation4], 1 }

</bundles_post_ra>
